<compile_context>
chip_gen: v6e
topology: v6e:2x2x1
jax: 0.10.0
libtpu: 0.0.40
codegen_flags: <defaults>
</compile_context>

<pallas_src>
import jax
import jax.numpy as jnp
from jax.experimental import pallas as pl
from jax.experimental.pallas import tpu as pltpu

HIDDEN = 128  # fixed by the PyTorch module: Linear(in,128) -> Linear(128,128) -> Linear(128,out)


def _round_up(n, m):
    return ((n + m - 1) // m) * m


def dqn_kernel(x_ref, w1_ref, b1_ref, w2_ref, b2_ref, w3_ref, b3_ref, o_ref):
    """Fused fc1+ReLU -> fc2+ReLU -> fc3 for one batch tile (MXU matmuls, f32 accumulate)."""
    mm_dtype = w1_ref.dtype  # bf16 matmul inputs; accumulation is always f32.

    # fc1 + ReLU (x already streamed in mm_dtype -> no per-step cast, half the DMA bytes)
    h = jnp.dot(x_ref[...], w1_ref[...], preferred_element_type=jnp.float32)
    h = jnp.maximum(h + b1_ref[...], 0.0)
    # fc2 + ReLU
    h = jnp.dot(h.astype(mm_dtype), w2_ref[...], preferred_element_type=jnp.float32)
    h = jnp.maximum(h + b2_ref[...], 0.0)
    # fc3 (no activation)
    out = jnp.dot(h.astype(mm_dtype), w3_ref[...], preferred_element_type=jnp.float32)
    o_ref[...] = (out + b3_ref[...]).astype(o_ref.dtype)


def init_dqn_params(key, input_size, output_size, hidden=HIDDEN):
    """Deterministic init mimicking nn.Linear's uniform(-1/sqrt(fan_in), 1/sqrt(fan_in))."""
    ks = jax.random.split(key, 6)

    def uniform(k, shape, fan_in):
        bound = 1.0 / jnp.sqrt(jnp.float32(fan_in))
        return jax.random.uniform(k, shape, jnp.float32, -bound, bound)

    return {
        "w1": uniform(ks[0], (input_size, hidden), input_size),
        "b1": uniform(ks[1], (1, hidden), input_size),
        "w2": uniform(ks[2], (hidden, hidden), hidden),
        "b2": uniform(ks[3], (1, hidden), hidden),
        "w3": uniform(ks[4], (hidden, output_size), hidden),
        "b3": uniform(ks[5], (1, output_size), hidden),
    }


def prepare_dqn_params(params, matmul_dtype=jnp.bfloat16):
    """One-time weight prep (pad + cast), hoisted out of the forward hot path.

    * w3/b3 are zero-padded to a lane-dense 128-wide output (exact math, cols sliced off).
    * Weights are cast to the matmul dtype once here.
    """
    w1, b1, w2, b2, w3, b3 = (params[k] for k in ("w1", "b1", "w2", "b2", "w3", "b3"))
    in_size, hidden = w1.shape
    out_size = w3.shape[1]
    out_pad = _round_up(max(out_size, 1), 128)

    return {
        "w1": w1.astype(matmul_dtype),                                              # (in, 128), K=36 is fine for the MXU
        "b1": b1,                                                                   # (1, 128) f32
        "w2": w2.astype(matmul_dtype),                                              # (128, 128)
        "b2": b2,                                                                   # (1, 128) f32
        "w3": jnp.pad(w3, ((0, 0), (0, out_pad - out_size))).astype(matmul_dtype),  # (128, out_pad)
        "b3": jnp.pad(b3, ((0, 0), (0, out_pad - out_size))),                       # (1, out_pad) f32
        "in_size": in_size,
        "hidden": hidden,
        "out_size": out_size,
        "out_pad": out_pad,
    }


def dqn_forward(x, prepared, *, tile_b=None, unpad_output=True):
    """x: [B, input_size] float32. prepared: output of prepare_dqn_params (weights already padded/cast).

    tile_b: batch rows per grid step. Default: one tile if the batch fits a 256-row
    MXU tile (v6e/v7x), else 256-row tiles. For very large batches raise to 512-2048
    (weights are resident; only x/out tiles scale). v5e: 128 already fills its MXUs.
    """
    w1, b1, w2, b2, w3, b3 = (prepared[k] for k in ("w1", "b1", "w2", "b2", "w3", "b3"))
    in_size, hidden = prepared["in_size"], prepared["hidden"]
    out_size, out_pad = prepared["out_size"], prepared["out_pad"]
    mm_dtype = w1.dtype

    B, x_in = x.shape
    assert x_in == in_size, f"x feature dim {x_in} != {in_size}"

    if tile_b is None:
        tile_b = min(256, _round_up(B, 16))
    assert tile_b % 16 == 0, "tile_b must be a multiple of 16 (bf16 sublane packing)"

    b_pad = _round_up(B, tile_b)
    grid = (b_pad // tile_b,)

    # Only wrapper op on x in the hot path: batch-row pad + cast to the matmul dtype.
    x_p = jnp.pad(x, ((0, b_pad - B), (0, 0))).astype(mm_dtype)

    # x / out stream one batch tile per grid step; weights & biases stay VMEM-resident.
    x_spec = pl.BlockSpec((tile_b, in_size), lambda i: (i, 0))
    out_spec = pl.BlockSpec((tile_b, out_pad), lambda i: (i, 0))

    def resident(shape):
        return pl.BlockSpec(shape, lambda i: (0, 0))

    flops = 2 * b_pad * (in_size * hidden + hidden * hidden + hidden * out_pad)
    weight_bytes = sum(int(a.size) * a.dtype.itemsize for a in (w1, b1, w2, b2, w3, b3))
    bytes_accessed = int(x_p.size) * x_p.dtype.itemsize + weight_bytes + b_pad * out_pad * 4

    out = pl.pallas_call(
        dqn_kernel,
        out_shape=jax.ShapeDtypeStruct((b_pad, out_pad), jnp.float32),
        grid=grid,
        in_specs=[
            x_spec,
            resident((in_size, hidden)),   # w1
            resident((1, hidden)),         # b1
            resident((hidden, hidden)),    # w2
            resident((1, hidden)),         # b2
            resident((hidden, out_pad)),   # w3
            resident((1, out_pad)),        # b3
        ],
        out_specs=out_spec,
        compiler_params=pltpu.CompilerParams(
            # Batch tiles are independent. On v7x, switch to
            # dimension_semantics=(pltpu.CORE_PARALLEL,) to shard tiles across both TCs.
            dimension_semantics=("parallel",),
        ),
        cost_estimate=pl.CostEstimate(
            flops=flops, transcendentals=0, bytes_accessed=bytes_accessed),
    )(x_p, w1, b1, w2, b2, w3, b3)

    if unpad_output:
        out = out[:B, :out_size]
    return out


if __name__ == "__main__":
    # Minesweeper-style DQN: flattened 6x6 board in, one Q-value per cell out.
    batch = 8
    input_size = 36
    output_size = 36

    key = jax.random.PRNGKey(0)
    pkey, xkey = jax.random.split(key)
    raw_params = init_dqn_params(pkey, input_size, output_size)
    prepared = prepare_dqn_params(raw_params)   # one-time pad/cast, hoisted out of the hot path
    x = jax.random.normal(xkey, (batch, input_size), jnp.float32)

    out = jax.block_until_ready(dqn_forward(x, prepared))
    assert out.shape == (batch, output_size)

    # Mirror reference (same bf16-input / f32-accumulate math) for a tight check.
    mm = jnp.bfloat16
    h = jnp.dot(x.astype(mm), raw_params["w1"].astype(mm), preferred_element_type=jnp.float32)
    h = jnp.maximum(h + raw_params["b1"], 0.0)
    h = jnp.dot(h.astype(mm), raw_params["w2"].astype(mm), preferred_element_type=jnp.float32)
    h = jnp.maximum(h + raw_params["b2"], 0.0)
    ref_bf16 = jnp.dot(h.astype(mm), raw_params["w3"].astype(mm),
                       preferred_element_type=jnp.float32) + raw_params["b3"]
    assert jnp.allclose(out, ref_bf16, atol=5e-3, rtol=5e-3)

    # Loose sanity check against the full-f32 PyTorch-equivalent forward.
    h1 = jnp.maximum(x @ raw_params["w1"] + raw_params["b1"], 0.0)
    h2 = jnp.maximum(h1 @ raw_params["w2"] + raw_params["b2"], 0.0)
    ref_f32 = h2 @ raw_params["w3"] + raw_params["b3"]
    assert jnp.allclose(out, ref_f32, atol=5e-2, rtol=5e-2)

    print("KERNEL_OK")
</pallas_src>

<mosaic_0001>
module attributes {stable_mosaic.version = 11 : i64} {
  func.func @dqn_kernel(%arg0: i32, %arg1: memref<16x36xbf16, #tpu.memory_space<vmem>>, %arg2: memref<36x128xbf16, #tpu.memory_space<vmem>>, %arg3: memref<1x128xf32, #tpu.memory_space<vmem>>, %arg4: memref<128x128xbf16, #tpu.memory_space<vmem>>, %arg5: memref<1x128xf32, #tpu.memory_space<vmem>>, %arg6: memref<128x128xbf16, #tpu.memory_space<vmem>>, %arg7: memref<1x128xf32, #tpu.memory_space<vmem>>, %arg8: memref<16x128xf32, #tpu.memory_space<vmem>>) attributes {dimension_semantics = [#tpu.dimension_semantics<parallel>], iteration_bounds = array<i64: 1>, scalar_prefetch = 0 : i64, scratch_operands = 0 : i64, tpu.core_type = #tpu.core_type<tc>, window_params = [{transform_indices = @transform_0, window_bounds = array<i64: 16, 36>}, {pipeline_mode = #tpu.pipeline_mode<synchronous>, transform_indices = @transform_1, window_bounds = array<i64: 36, 128>}, {pipeline_mode = #tpu.pipeline_mode<synchronous>, transform_indices = @transform_2, window_bounds = array<i64: 1, 128>}, {pipeline_mode = #tpu.pipeline_mode<synchronous>, transform_indices = @transform_3, window_bounds = array<i64: 128, 128>}, {pipeline_mode = #tpu.pipeline_mode<synchronous>, transform_indices = @transform_4, window_bounds = array<i64: 1, 128>}, {pipeline_mode = #tpu.pipeline_mode<synchronous>, transform_indices = @transform_5, window_bounds = array<i64: 128, 128>}, {pipeline_mode = #tpu.pipeline_mode<synchronous>, transform_indices = @transform_6, window_bounds = array<i64: 1, 128>}, {transform_indices = @transform_7, window_bounds = array<i64: 16, 128>}]} {
    %c0 = arith.constant 0 : index
    %c0_0 = arith.constant 0 : index
    %0 = vector.load %arg1[%c0, %c0_0] : memref<16x36xbf16, #tpu.memory_space<vmem>>, vector<16x36xbf16>
    %c0_1 = arith.constant 0 : index
    %c0_2 = arith.constant 0 : index
    %1 = vector.load %arg2[%c0_1, %c0_2] : memref<36x128xbf16, #tpu.memory_space<vmem>>, vector<36x128xbf16>
    %cst = arith.constant dense<0.000000e+00> : vector<16x128xf32>
    %2 = tpu.matmul %0, %1, %cst {dimension_numbers = #tpu.dot_dimension_numbers<[1], [0], [0], [1], [0, 0, 1, 1], [], []>} : vector<16x36xbf16>, vector<36x128xbf16>, vector<16x128xf32> -> vector<16x128xf32>
    %c0_3 = arith.constant 0 : index
    %c0_4 = arith.constant 0 : index
    %3 = vector.load %arg3[%c0_3, %c0_4] : memref<1x128xf32, #tpu.memory_space<vmem>>, vector<1x128xf32>
    %4 = vector.broadcast %3 : vector<1x128xf32> to vector<16x128xf32>
    %5 = arith.addf %2, %4 : vector<16x128xf32>
    %cst_5 = arith.constant 0.000000e+00 : f32
    %6 = vector.broadcast %cst_5 : f32 to vector<16x128xf32>
    %7 = arith.maximumf %5, %6 : vector<16x128xf32>
    %8 = arith.truncf %7 : vector<16x128xf32> to vector<16x128xbf16>
    %c0_6 = arith.constant 0 : index
    %c0_7 = arith.constant 0 : index
    %9 = vector.load %arg4[%c0_6, %c0_7] : memref<128x128xbf16, #tpu.memory_space<vmem>>, vector<128x128xbf16>
    %cst_8 = arith.constant dense<0.000000e+00> : vector<16x128xf32>
    %10 = tpu.matmul %8, %9, %cst_8 {dimension_numbers = #tpu.dot_dimension_numbers<[1], [0], [0], [1], [0, 0, 1, 1], [], []>} : vector<16x128xbf16>, vector<128x128xbf16>, vector<16x128xf32> -> vector<16x128xf32>
    %c0_9 = arith.constant 0 : index
    %c0_10 = arith.constant 0 : index
    %11 = vector.load %arg5[%c0_9, %c0_10] : memref<1x128xf32, #tpu.memory_space<vmem>>, vector<1x128xf32>
    %12 = vector.broadcast %11 : vector<1x128xf32> to vector<16x128xf32>
    %13 = arith.addf %10, %12 : vector<16x128xf32>
    %cst_11 = arith.constant 0.000000e+00 : f32
    %14 = vector.broadcast %cst_11 : f32 to vector<16x128xf32>
    %15 = arith.maximumf %13, %14 : vector<16x128xf32>
    %16 = arith.truncf %15 : vector<16x128xf32> to vector<16x128xbf16>
    %c0_12 = arith.constant 0 : index
    %c0_13 = arith.constant 0 : index
    %17 = vector.load %arg6[%c0_12, %c0_13] : memref<128x128xbf16, #tpu.memory_space<vmem>>, vector<128x128xbf16>
    %cst_14 = arith.constant dense<0.000000e+00> : vector<16x128xf32>
    %18 = tpu.matmul %16, %17, %cst_14 {dimension_numbers = #tpu.dot_dimension_numbers<[1], [0], [0], [1], [0, 0, 1, 1], [], []>} : vector<16x128xbf16>, vector<128x128xbf16>, vector<16x128xf32> -> vector<16x128xf32>
    %c0_15 = arith.constant 0 : index
    %c0_16 = arith.constant 0 : index
    %19 = vector.load %arg7[%c0_15, %c0_16] : memref<1x128xf32, #tpu.memory_space<vmem>>, vector<1x128xf32>
    %20 = vector.broadcast %19 : vector<1x128xf32> to vector<16x128xf32>
    %21 = arith.addf %18, %20 : vector<16x128xf32>
    %c0_17 = arith.constant 0 : index
    %c0_18 = arith.constant 0 : index
    %22 = vector.load %arg8[%c0_17, %c0_18] : memref<16x128xf32, #tpu.memory_space<vmem>>, vector<16x128xf32>
    tpu.vector_store %arg8[%c0_17, %c0_18], %21 {strides = array<i32>} : memref<16x128xf32, #tpu.memory_space<vmem>>, vector<16x128xf32>,
    return
  }
  func.func @transform_0(%arg0: i32) -> (i32, i32) {
    %c0_i32 = arith.constant 0 : i32
    %c0_i32_0 = arith.constant 0 : i32
    return %arg0, %c0_i32 : i32, i32
  }
  func.func @transform_1(%arg0: i32) -> (i32, i32) {
    %c0_i32 = arith.constant 0 : i32
    %c0_i32_0 = arith.constant 0 : i32
    %c0_i32_1 = arith.constant 0 : i32
    return %c0_i32, %c0_i32_0 : i32, i32
  }
  func.func @transform_2(%arg0: i32) -> (i32, i32) {
    %c0_i32 = arith.constant 0 : i32
    %c0_i32_0 = arith.constant 0 : i32
    %c0_i32_1 = arith.constant 0 : i32
    return %c0_i32, %c0_i32_0 : i32, i32
  }
  func.func @transform_3(%arg0: i32) -> (i32, i32) {
    %c0_i32 = arith.constant 0 : i32
    %c0_i32_0 = arith.constant 0 : i32
    %c0_i32_1 = arith.constant 0 : i32
    return %c0_i32, %c0_i32_0 : i32, i32
  }
  func.func @transform_4(%arg0: i32) -> (i32, i32) {
    %c0_i32 = arith.constant 0 : i32
    %c0_i32_0 = arith.constant 0 : i32
    %c0_i32_1 = arith.constant 0 : i32
    return %c0_i32, %c0_i32_0 : i32, i32
  }
  func.func @transform_5(%arg0: i32) -> (i32, i32) {
    %c0_i32 = arith.constant 0 : i32
    %c0_i32_0 = arith.constant 0 : i32
    %c0_i32_1 = arith.constant 0 : i32
    return %c0_i32, %c0_i32_0 : i32, i32
  }
  func.func @transform_6(%arg0: i32) -> (i32, i32) {
    %c0_i32 = arith.constant 0 : i32
    %c0_i32_0 = arith.constant 0 : i32
    %c0_i32_1 = arith.constant 0 : i32
    return %c0_i32, %c0_i32_0 : i32, i32
  }
  func.func @transform_7(%arg0: i32) -> (i32, i32) {
    %c0_i32 = arith.constant 0 : i32
    %c0_i32_0 = arith.constant 0 : i32
    return %arg0, %c0_i32 : i32, i32
  }
}

</mosaic_0001>

<bundles_post_ra>
// kernel: tpu_custom_call.1
= control target key start
LH: loop header
LB: loop body
LE: loop exit
PB: predicated region body
PF: predicated region fallthrough
CT: control target
= control target key end

     0   :  { %12 = vsyncpa [#allocation3], 0  ;;  %s764_s0 = inlined_call_operand.hbm [shape: bf16[16,36], index: 0, kind: input, shape index: {}]   ;;  %s765_s1 = inlined_call_operand.hbm [shape: bf16[36,128], index: 1, kind: input, shape index: {}]   ;;  %s766_s2 = inlined_call_operand.vmem [shape: f32[1,128], index: 2, kind: input, shape index: {}]   ;;  %s767_s3 = inlined_call_operand.hbm [shape: bf16[128,128], index: 3, kind: input, shape index: {}]   ;;  %s768_s4 = inlined_call_operand.vmem [shape: f32[1,128], index: 4, kind: input, shape index: {}]   ;;  %s769_s5 = inlined_call_operand.hbm [shape: bf16[128,128], index: 5, kind: input, shape index: {}]   ;;  %s770_s6 = inlined_call_operand.vmem [shape: f32[1,128], index: 6, kind: input, shape index: {}]   ;;  %s771_s7 = inlined_call_operand.hbm [shape: f32[16,128], index: 7, kind: output, shape index: {}]  }
   0x1   :  { %13 = vsyncpa [#allocation6], 0 }
   0x2   :  { %14 = vsyncpa [#allocation9], 0 }
   0x3   :  { %15 = vsyncpa [#allocation4], 0  ;;  %s652_s24 = smov [#allocation5]   ;;  %s653_s26 = smov [#allocation2]  }
   0x4   :  { %s33_s25 = sshll.u32 %s652_s24, 4  ;;  %s21_s27 = sshll.u32 %s653_s26, 4  ;;  %s34_s25 = int_to_ptr.vmem [resolvable:$true] %s33_s25  ;;  %s22_s27 = int_to_ptr.vmem [resolvable:$true] %s21_s27 }
   0x5   :  { %s552_s28 = scalar_lea.vmem %s34_s25, 320  ;;  %p557_p1 = scmp.lt.s32.totalorder %s34_s25, %s34_s25 }
   0x6   :  { %p553_p0 = scmp.ne.s32.totalorder %s34_s25, %s552_s28  ;;  %p558_p2 = scmp.lt.s32.totalorder %s552_s28, %s552_s28 }
   0x8   :  { %p559_p3 = por %p558_p2, %p557_p1 }
   0xa   :  { %p560_p4 = pnand %p559_p3, %p553_p0 }
   0xc   :  { %563 = shalt.err (!%p560_p4)
}
   0xd   :  { %s654_s29 = smov 64   ;;  %s655_s30 = smov 4  }
   0xe   :  { %39 = dma.hbm_to_vmem [thread:$0]  %s765_s1, 320, %s34_s25, [#allocation6], %s654_s29, %s654_s29, %s655_s30  }
   0xf   :  { %s572_s10 = scalar_lea.vmem %s22_s27, 128  ;;  %p577_p6 = scmp.lt.s32.totalorder %s22_s27, %s22_s27 }
  0x10   :  { %p573_p5 = scmp.ne.s32.totalorder %s22_s27, %s572_s10  ;;  %p578_p7 = scmp.lt.s32.totalorder %s572_s10, %s572_s10 }
  0x12   :  { %p579_p8 = por %p578_p7, %p577_p6 }
  0x14   :  { %p580_p9 = pnand %p579_p8, %p573_p5 }
  0x16   :  { %583 = shalt.err (!%p580_p9)
}
  0x17   :  { %27 = dma.hbm_to_vmem [thread:$0]  %s764_s0, 128, %s22_s27, [#allocation3], %s654_s29, %s654_s29, %s655_s30  }
  0x18   :  { %s656_s13 = smov [#allocation7]   ;;  %s657_s15 = smov [#allocation8]  }
  0x19   :  { %s47_s14 = sshll.u32 %s656_s13, 4  ;;  %s61_s16 = sshll.u32 %s657_s15, 4  ;;  %s48_s14 = int_to_ptr.vmem [resolvable:$true] %s47_s14  ;;  %s62_s16 = int_to_ptr.vmem [resolvable:$true] %s61_s16 }
  0x1a   :  { %s592_s1 = scalar_lea.vmem %s48_s14, 1024  ;;  %p597_p11 = scmp.lt.s32.totalorder %s48_s14, %s48_s14 }
  0x1b   :  { %p593_p10 = scmp.ne.s32.totalorder %s48_s14, %s592_s1  ;;  %p598_p12 = scmp.lt.s32.totalorder %s592_s1, %s592_s1 }
  0x1d   :  { %p599_p13 = por %p598_p12, %p597_p11 }
  0x1f   :  { %p600_p0 = pnand %p599_p13, %p593_p10 }
  0x21   :  { %603 = shalt.err (!%p600_p0)
}
  0x22   :  { %53 = dma.hbm_to_vmem [thread:$0]  %s767_s3, 1024, %s48_s14, [#allocation6], %s654_s29, %s654_s29, %s655_s30  }
  0x23   :  { %s612_s0 = scalar_lea.vmem %s62_s16, 1024  ;;  %p617_p2 = scmp.lt.s32.totalorder %s62_s16, %s62_s16 }
  0x24   :  { %p613_p1 = scmp.ne.s32.totalorder %s62_s16, %s612_s0  ;;  %p618_p3 = scmp.lt.s32.totalorder %s612_s0, %s612_s0 }
  0x26   :  { %p619_p4 = por %p618_p3, %p617_p2 }
  0x28   :  { %p620_p5 = pnand %p619_p4, %p613_p1 }
  0x2a   :  { %623 = shalt.err (!%p620_p5)
}
  0x2b   :  { %67 = dma.hbm_to_vmem [thread:$0]  %s769_s5, 1024, %s62_s16, [#allocation9], %s654_s29, %s654_s29, %s655_s30  }
  0x2c   :  { %644 = dma.done.wait [#allocation3], 128  }
  0x2d   :  { %645 = vsyncadd [#allocation3], 4294967168 }
  0x2e   :  { %646 = dma.done.wait [#allocation6], 1344  }
  0x2f   :  { %647 = vsyncadd [#allocation6], 4294965952 }
  0x30   :  { %648 = dma.done.wait [#allocation9], 1024  }
  0x31   :  { %649 = vsyncadd [#allocation9], 4294966272  ;;  %v658_v0 = vmov 0.0   ;;  %vm659_vm0 = vmmov 0   ;;  %vm121_vm1 = vcmask 1041408   ;;  %v525_v3 = vld [vmem:[#allocation5 + $0x8] sm:$0xff]  }
  0x32   :  { %463 = vmatprep.subr.bf16.mxu0 %v658_v0  ;;  %469 = vmatprep.mubr.msk.bf16.mxu0 %vm659_vm0, %v658_v0  ;;  %v524_v1 = vld [vmem:[#allocation5 + $0x10] ss:$0 sps:$4 sm:$0x33]   ;;  %v529_v5 = vld [vmem:[#allocation7 + $0x30] sm:$0xff]   ;;  %v527_v7 = vld [vmem:[#allocation2] sm:$0xff]   ;;  %vm117_vm2 = vcmask 293888  }
  0x33   :  { %473 = vmatprep.subr.bf16.mxu1 %v658_v0  ;;  %489 = vmatprep.mubr.msk.bf16.mxu1 %vm659_vm0, %v658_v0  ;;  %v123_v2 = vsel %vm121_vm1, %v524_v1, 0  ;;  %v528_v4 = vld [vmem:[#allocation7 + $0x38] sm:$0xff]   ;;  %v526_v6 = vld [vmem:[#allocation5] sm:$0xff]   ;;  %v531_v9 = vld [vmem:[#allocation7 + $0x20] sm:$0xff]   ;;  %s660_s24 = smov [#allocation10]  }
  0x34   :  { %464 = vmatpush3.bf16.msra.mxu0 %v123_v2  ;;  %474 = vmatpush3.bf16.msra.mxu1 %v528_v4  ;;  %v530_v8 = vld [vmem:[#allocation7 + $0x28] sm:$0xff]   ;;  %v532_v10 = vld [vmem:[#allocation7 + $0x18] sm:$0xff]   ;;  %v533_v11 = vld [vmem:[#allocation7 + $0x10] sm:$0xff]   ;;  %s403_s25 = sshll.u32 %s660_s24, 4  ;;  %s404_s25 = int_to_ptr.vmem [resolvable:$true] %s403_s25 }
  0x35   :  { %465 = vmatprep.subr.bf16.mxu0 %v658_v0  ;;  %475 = vmatprep.subr.bf16.mxu1 %v658_v0  ;;  %v534_v12 = vld [vmem:[#allocation7 + $0x8] sm:$0xff]   ;;  %v535_v13 = vld [vmem:[#allocation7] sm:$0xff]   ;;  %v536_v14 = vld [vmem:[#allocation8 + $0x38] sm:$0xff]   ;;  %p629_p7 = scmp.lt.s32.totalorder %s404_s25, %s404_s25 }
  0x36   :  { %v537_v15 = vld [vmem:[#allocation8 + $0x30] sm:$0xff]   ;;  %v538_v16 = vld [vmem:[#allocation8 + $0x28] sm:$0xff]   ;;  %v539_v17 = vld [vmem:[#allocation8 + $0x20] sm:$0xff]  }
  0x37   :  { %v540_v18 = vld [vmem:[#allocation8 + $0x18] sm:$0xff]   ;;  %v417_v19 = vld [vmem:[%s766_s2] ss:$0 sm:$0xff]  ;;  %v541_v29 = vld [vmem:[#allocation8 + $0x10] sm:$0xff]  }
  0x38   :  { %466 = vmatpush3.bf16.msra.mxu0 %v525_v3  ;;  %476 = vmatpush3.bf16.msra.mxu1 %v529_v5  ;;  %v542_v30 = vld [vmem:[#allocation8 + $0x8] sm:$0xff]   ;;  %v543_v31 = vld [vmem:[#allocation8] sm:$0xff]  }
  0x39   :  { %467 = vmatprep.subr.bf16.mxu0 %v658_v0  ;;  %477 = vmatprep.subr.bf16.mxu1 %v658_v0  ;;  %v423_v32 = vld [vmem:[%s768_s4] ss:$0 sm:$0xff]  ;;  %s624_s4 = scalar_lea.vmem %s404_s25, 256 }
  0x3a   :  { %v432_v42 = vld [vmem:[%s770_s6] ss:$0 sm:$0xff]  ;;  %p625_p6 = scmp.ne.s32.totalorder %s404_s25, %s624_s4  ;;  %p630_p8 = scmp.lt.s32.totalorder %s624_s4, %s624_s4 }
  0x3c   :  { %468 = vmatpush3.bf16.msra.mxu0 %v526_v6  ;;  %478 = vmatpush3.bf16.msra.mxu1 %v530_v8  ;;  %p631_p9 = por %p630_p8, %p629_p7 }
  0x3d   :  { %493 = vmatprep.subr.bf16.mxu0 %v658_v0  ;;  %479 = vmatprep.subr.bf16.mxu1 %v658_v0 }
  0x3e   :  { %p632_p10 = pnand %p631_p9, %p625_p6 }
  0x3f   :  { %470 = vmatmul.mubr.msk.bf16.vlgmr.msra.gmra.mxu0 %vm117_vm2, %v527_v7 }
  0x40   :  { %509 = vmatprep.mubr.msk.bf16.mxu0 %vm659_vm0, %v658_v0  ;;  %480 = vmatpush3.bf16.msra.mxu1 %v531_v9 }
  0x41   :  { %481 = vmatprep.subr.bf16.mxu1 %v658_v0  ;;  %494 = vmatpush3.bf16.msra.mxu0 %v536_v14 }
  0x42   :  { %495 = vmatprep.subr.bf16.mxu0 %v658_v0 }
  0x44   :  { %482 = vmatpush3.bf16.msra.mxu1 %v532_v10 }
  0x45   :  { %483 = vmatprep.subr.bf16.mxu1 %v658_v0  ;;  %496 = vmatpush3.bf16.msra.mxu0 %v537_v15 }
  0x46   :  { %497 = vmatprep.subr.bf16.mxu0 %v658_v0 }
  0x48   :  { %484 = vmatpush3.bf16.msra.mxu1 %v533_v11 }
  0x49   :  { %485 = vmatprep.subr.bf16.mxu1 %v658_v0  ;;  %498 = vmatpush3.bf16.msra.mxu0 %v538_v16 }
  0x4a   :  { %499 = vmatprep.subr.bf16.mxu0 %v658_v0 }
  0x4c   :  { %486 = vmatpush3.bf16.msra.mxu1 %v534_v12 }
  0x4d   :  { %487 = vmatprep.subr.bf16.mxu1 %v658_v0  ;;  %500 = vmatpush3.bf16.msra.mxu0 %v539_v17 }
  0x4e   :  { %501 = vmatprep.subr.bf16.mxu0 %v658_v0 }
  0x50   :  { %488 = vmatpush3.bf16.msra.mxu1 %v535_v13 }
  0x51   :  { %502 = vmatpush3.bf16.msra.mxu0 %v540_v18 }
  0x52   :  { %503 = vmatprep.subr.bf16.mxu0 %v658_v0 }
  0x55   :  { %504 = vmatpush3.bf16.msra.mxu0 %v541_v29 }
  0x56   :  { %505 = vmatprep.subr.bf16.mxu0 %v658_v0 }
  0x59   :  { %506 = vmatpush3.bf16.msra.mxu0 %v542_v30 }
  0x5a   :  { %507 = vmatprep.subr.bf16.mxu0 %v658_v0 }
  0x5d   :  { %508 = vmatpush3.bf16.msra.mxu0 %v543_v31 }
  0xff   :  { %v159_v20 = vpop.f32.mrf.mxu0 }
 0x100   :  { %v160_v22 = vadd.f32 %v417_v19, %v159_v20 }
 0x101   :  { %v471_v21 = vpop.f32.mrf.mxu0 }
 0x102   :  { %v166_v26 = vmax.f32 %v160_v22, 0.0 }
 0x103   :  { %v162_v23 = vpop.f32.mrf.mxu0 }
 0x104   :  { %v163_v24 = vadd.f32 %v417_v19, %v162_v23 }
 0x105   :  { %v472_v25 = vpop.f32.mrf.mxu0 }
 0x106   :  { %v167_v27 = vmax.f32 %v163_v24, 0.0 }
 0x108   :  { %v168_v28 = vpack.c.bf16 %v167_v27, %v166_v26 }
 0x10a   :  { %490 = vmatmul.mubr.bf16.vlgmr.msra.gmra.mxu1 %v168_v28 }
 0x1ca   :  { %v274_v33 = vpop.f32.mrf.mxu1 }
 0x1cb   :  { %v275_v35 = vadd.f32 %v423_v32, %v274_v33 }
 0x1cc   :  { %v491_v34 = vpop.f32.mrf.mxu1 }
 0x1cd   :  { %v281_v39 = vmax.f32 %v275_v35, 0.0 }
 0x1ce   :  { %v277_v36 = vpop.f32.mrf.mxu1 }
 0x1cf   :  { %v278_v37 = vadd.f32 %v423_v32, %v277_v36 }
 0x1d0   :  { %v492_v38 = vpop.f32.mrf.mxu1 }
 0x1d1   :  { %v282_v40 = vmax.f32 %v278_v37, 0.0 }
 0x1d3   :  { %v283_v41 = vpack.c.bf16 %v282_v40, %v281_v39 }
 0x1d5   :  { %510 = vmatmul.mubr.bf16.vlgmr.msra.gmra.mxu0 %v283_v41 }
 0x295   :  { %v389_v43 = vpop.f32.mrf.mxu0 }
 0x296   :  { %v390_v44 = vadd.f32 %v432_v42, %v389_v43 }
 0x297   :  { %v511_v45 = vpop.f32.mrf.mxu0 }
 0x298   :  { %396 = vst [vmem:[#allocation10] sm:$0xff] %v390_v44 }
 0x299   :  { %v392_v46 = vpop.f32.mrf.mxu0 }
 0x29a   :  { %v393_v47 = vadd.f32 %v432_v42, %v392_v46 }
 0x29b   :  { %v512_v48 = vpop.f32.mrf.mxu0 }
 0x29c   :  { %397 = vst [vmem:[#allocation10 + $0x8] sm:$0xff] %v393_v47 }
 0x29d   :  { %635 = shalt.err (!%p632_p10)
}
 0x29e   :  { %s661_s26 = smov 128   ;;  %s662_s6 = smov 8  }
 0x29f   :  { %409 = dma.vmem_to_hbm [thread:$0]  %s404_s25, 256, %s771_s7, [#allocation4], %s661_s26, %s661_s26, %s662_s6  }
 0x2a0   :  { %650 = dma.done.wait [#allocation4], 256  }
 0x2a1   :  { %651 = vsyncadd [#allocation4], 4294967040 }
 0x2a2   :  { %413 = vsyncpa [#allocation3], 1 }
 0x2a3   :  { %414 = vsyncpa [#allocation6], 1 }
 0x2a4   :  { %415 = vsyncpa [#allocation9], 1 }
 0x2a5   :  { %416 = vsyncpa [#allocation4], 1 }

</bundles_post_ra>
